<compile_context>
chip_gen: v5e
topology: v5e:2x2
jax: 0.10.0
libtpu: 0.0.40
codegen_flags: <defaults>
</compile_context>

<pallas_src>
import jax
import jax.numpy as jnp
from jax.experimental import pallas as pl
from jax.experimental.pallas import tpu as pltpu

LANE = 128
SUBLANE = 8


def _round_up(x, m):
    return ((x + m - 1) // m) * m


def logreg_kernel(x_ref, w_ref, b_ref, o_ref):
    # x_ref: [tile_n, K], w_ref: [K, M_pad], b_ref: [1, M_pad]
    o_ref[...] = (
        jnp.dot(x_ref[...], w_ref[...], preferred_element_type=jnp.float32)
        + b_ref[...]
    )


def logreg_forward(x, weight, bias, *, max_rows_per_tile=512):
    """LogReg forward pass: x @ weight.T + bias.

    x:      [N, hid_dim]        (float)
    weight: [out_dim, hid_dim]  (PyTorch nn.Linear layout)
    bias:   [out_dim]
    returns [N, out_dim] float32
    """
    n, k = x.shape
    out_dim = weight.shape[0]

    # Pre-transpose W to [K, out] and zero-pad the output columns up to a
    # lane-dense multiple of 128 (padded columns produce zeros + zero bias,
    # sliced off below).
    m_pad = _round_up(out_dim, LANE)
    w_t = (
        jnp.zeros((k, m_pad), jnp.float32)
        .at[:, :out_dim]
        .set(weight.T.astype(jnp.float32))
    )
    b_row = (
        jnp.zeros((1, m_pad), jnp.float32)
        .at[:, :out_dim]
        .set(bias.astype(jnp.float32))
    )

    # Batch tiling: multiples of 8 sublanes, capped so VMEM stays tiny on all
    # generations.  Pad N up to a whole number of tiles (padding rows are
    # zeros and are discarded after the call).
    tile_n = min(_round_up(n, SUBLANE), max_rows_per_tile)
    n_pad = _round_up(n, tile_n)
    x = x.astype(jnp.float32)
    if n_pad != n:
        x = jnp.pad(x, ((0, n_pad - n), (0, 0)))

    out = pl.pallas_call(
        logreg_kernel,
        out_shape=jax.ShapeDtypeStruct((n_pad, m_pad), jnp.float32),
        grid_spec=pltpu.PrefetchScalarGridSpec(
            num_scalar_prefetch=0,
            grid=(n_pad // tile_n,),
            in_specs=[
                pl.BlockSpec((tile_n, k), lambda i: (i, 0)),   # x tile
                pl.BlockSpec((k, m_pad), lambda i: (0, 0)),    # W (resident)
                pl.BlockSpec((1, m_pad), lambda i: (0, 0)),    # bias row
            ],
            out_specs=pl.BlockSpec((tile_n, m_pad), lambda i: (i, 0)),
        ),
        compiler_params=pltpu.CompilerParams(
            # Batch tiles are independent -> v7x's second TensorCore gets half
            # of them; harmless on single-TC v5e/v6e.
            dimension_semantics=("parallel",),
        ),
    )(x, w_t, b_row)

    return out[:n, :out_dim]


def reference_forward(x, weight, bias):
    return x.astype(jnp.float32) @ weight.T.astype(jnp.float32) + bias.astype(
        jnp.float32
    )


if __name__ == "__main__":
    # Small shapes consistent with LogReg(hid_dim, out_dim).
    N, hid_dim, out_dim = 16, 32, 8

    key = jax.random.PRNGKey(0)
    kx, kw, kb = jax.random.split(key, 3)

    x = jax.random.normal(kx, (N, hid_dim), dtype=jnp.float32)

    # PyTorch nn.Linear default init: U(-1/sqrt(in), 1/sqrt(in)) for W and b,
    # with W stored as [out_dim, hid_dim].
    lim = 1.0 / float(hid_dim) ** 0.5
    weight = jax.random.uniform(kw, (out_dim, hid_dim), jnp.float32, -lim, lim)
    bias = jax.random.uniform(kb, (out_dim,), jnp.float32, -lim, lim)

    out = logreg_forward(x, weight, bias)
    out = jax.block_until_ready(out)

    ref = reference_forward(x, weight, bias)
    assert out.shape == (N, out_dim)
    assert jnp.allclose(out, ref, atol=1e-5, rtol=1e-5), "mismatch vs reference"

    print("KERNEL_OK")
</pallas_src>

<mosaic_0001>
module attributes {stable_mosaic.version = 11 : i64} {
  func.func @logreg_kernel(%arg0: i32, %arg1: memref<16x32xf32, #tpu.memory_space<vmem>>, %arg2: memref<32x128xf32, #tpu.memory_space<vmem>>, %arg3: memref<1x128xf32, #tpu.memory_space<vmem>>, %arg4: memref<16x128xf32, #tpu.memory_space<vmem>>) attributes {dimension_semantics = [#tpu.dimension_semantics<parallel>], iteration_bounds = array<i64: 1>, scalar_prefetch = 0 : i64, scratch_operands = 0 : i64, tpu.core_type = #tpu.core_type<tc>, window_params = [{transform_indices = @transform_0, window_bounds = array<i64: 16, 32>}, {pipeline_mode = #tpu.pipeline_mode<synchronous>, transform_indices = @transform_1, window_bounds = array<i64: 32, 128>}, {pipeline_mode = #tpu.pipeline_mode<synchronous>, transform_indices = @transform_2, window_bounds = array<i64: 1, 128>}, {transform_indices = @transform_3, window_bounds = array<i64: 16, 128>}]} {
    %c0 = arith.constant 0 : index
    %c0_0 = arith.constant 0 : index
    %0 = vector.load %arg1[%c0, %c0_0] : memref<16x32xf32, #tpu.memory_space<vmem>>, vector<16x32xf32>
    %c0_1 = arith.constant 0 : index
    %c0_2 = arith.constant 0 : index
    %1 = vector.load %arg2[%c0_1, %c0_2] : memref<32x128xf32, #tpu.memory_space<vmem>>, vector<32x128xf32>
    %cst = arith.constant dense<0.000000e+00> : vector<16x128xf32>
    %2 = tpu.matmul %0, %1, %cst {dimension_numbers = #tpu.dot_dimension_numbers<[1], [0], [0], [1], [0, 0, 1, 1], [], []>} : vector<16x32xf32>, vector<32x128xf32>, vector<16x128xf32> -> vector<16x128xf32>
    %c0_3 = arith.constant 0 : index
    %c0_4 = arith.constant 0 : index
    %3 = vector.load %arg3[%c0_3, %c0_4] : memref<1x128xf32, #tpu.memory_space<vmem>>, vector<1x128xf32>
    %4 = vector.broadcast %3 : vector<1x128xf32> to vector<16x128xf32>
    %5 = arith.addf %2, %4 : vector<16x128xf32>
    %c0_5 = arith.constant 0 : index
    %c0_6 = arith.constant 0 : index
    %6 = vector.load %arg4[%c0_5, %c0_6] : memref<16x128xf32, #tpu.memory_space<vmem>>, vector<16x128xf32>
    tpu.vector_store %arg4[%c0_5, %c0_6], %5 {strides = array<i32>} : memref<16x128xf32, #tpu.memory_space<vmem>>, vector<16x128xf32>,
    return
  }
  func.func @transform_0(%arg0: i32) -> (i32, i32) {
    %c0_i32 = arith.constant 0 : i32
    %c0_i32_0 = arith.constant 0 : i32
    return %arg0, %c0_i32 : i32, i32
  }
  func.func @transform_1(%arg0: i32) -> (i32, i32) {
    %c0_i32 = arith.constant 0 : i32
    %c0_i32_0 = arith.constant 0 : i32
    %c0_i32_1 = arith.constant 0 : i32
    return %c0_i32, %c0_i32_0 : i32, i32
  }
  func.func @transform_2(%arg0: i32) -> (i32, i32) {
    %c0_i32 = arith.constant 0 : i32
    %c0_i32_0 = arith.constant 0 : i32
    %c0_i32_1 = arith.constant 0 : i32
    return %c0_i32, %c0_i32_0 : i32, i32
  }
  func.func @transform_3(%arg0: i32) -> (i32, i32) {
    %c0_i32 = arith.constant 0 : i32
    %c0_i32_0 = arith.constant 0 : i32
    return %arg0, %c0_i32 : i32, i32
  }
}

</mosaic_0001>

<bundles_post_ra>
// kernel: tpu_custom_call.1
= control target key start
LH: loop header
LB: loop body
LE: loop exit
PB: predicated region body
PF: predicated region fallthrough
CT: control target
= control target key end

     0   :  { %8 = vsyncpa [#allocation3], 0  ;;  %s245_s0 = inlined_call_operand.hbm [shape: f32[16,32], index: 0, kind: input, shape index: {}]   ;;  %s246_s1 = inlined_call_operand.hbm [shape: f32[32,128], index: 1, kind: input, shape index: {}]   ;;  %s247_s2 = inlined_call_operand.vmem [shape: f32[1,128], index: 2, kind: input, shape index: {}]   ;;  %s248_s3 = inlined_call_operand.hbm [shape: f32[16,128], index: 3, kind: output, shape index: {}]  }
   0x1   :  { %9 = vsyncpa [#allocation6], 0 }
   0x2   :  { %10 = vsyncpa [#allocation4], 0  ;;  %s15_s14 = sshll.u32 %s245_s0, 4  ;;  %s199_s15 = smov [#allocation2]   ;;  %s16_s14 = int_to_ptr.hbm [resolvable:$true] %s15_s14 }
   0x3   :  { %s17_s16 = sshll.u32 %s199_s15, 4  ;;  %s28_s19 = sshll.u32 %s246_s1, 4  ;;  %s18_s16 = int_to_ptr.vmem [resolvable:$true] %s17_s16  ;;  %s29_s19 = int_to_ptr.hbm [resolvable:$true] %s28_s19 }
   0x4   :  { %s200_s20 = smov 128   ;;  %s201_s21 = smov 8  }
   0x5   :  { %23 = dma.hbm_to_vmem [thread:$0]  %s16_s14, 256, %s18_s16, [#allocation3], %s200_s20, %s200_s20, %s201_s21  }
   0x6   :  { %s202_s22 = smov [#allocation5]  }
   0x7   :  { %s30_s23 = sshll.u32 %s202_s22, 4  ;;  %s31_s23 = int_to_ptr.vmem [resolvable:$true] %s30_s23 }
   0x8   :  { %36 = dma.hbm_to_vmem [thread:$0]  %s29_s19, 512, %s31_s23, [#allocation6], %s200_s20, %s200_s20, %s201_s21  }
   0x9   :  { %193 = dma.done.wait [#allocation3], 256  }
   0xa   :  { %194 = vsyncadd [#allocation3], 4294967040 }
   0xb   :  { %195 = dma.done.wait [#allocation6], 512  }
   0xc   :  { %196 = vsyncadd [#allocation6], 4294966784  ;;  %v52_v0 = vld [vmem:[#allocation5 + $0x18] sm:$0xff]  ;;  %v51_v1 = vld [vmem:[#allocation5 + $0x10] sm:$0xff]  ;;  %vm57_vm0 = vcmask 261120   ;;  %s203_s24 = smov [#allocation7]  }
   0xd   :  { %76 = vmatpush.msra.mxu0 %v52_v0  ;;  %111 = vmatpush.msra.mxu1 %v52_v0  ;;  %v50_v2 = vld [vmem:[#allocation5 + $0x8] sm:$0xff]  ;;  %v49_v3 = vld [vmem:[#allocation5] sm:$0xff]  ;;  %v47_v4 = vld [vmem:[#allocation2] sm:$0xff]  ;;  %s93_s25 = sshll.u32 %s203_s24, 4  ;;  %s95_s28 = sshll.u32 %s248_s3, 4  ;;  %s94_s25 = int_to_ptr.vmem [resolvable:$true] %s93_s25  ;;  %s96_s28 = int_to_ptr.hbm [resolvable:$true] %s95_s28 }
   0xe   :  { %v48_v5 = vld [vmem:[#allocation2 + $0x8] sm:$0xff]  ;;  %v120_v6 = vld [vmem:[%s247_s2] ss:$0 sm:$0xff] }
   0xf   :  { %77 = vmatpush.msra.mxu0 %v51_v1  ;;  %112 = vmatpush.msra.mxu1 %v51_v1 }
  0x11   :  { %78 = vmatpush.msra.mxu0 %v50_v2  ;;  %113 = vmatpush.msra.mxu1 %v50_v2 }
  0x13   :  { %79 = vmatpush.msra.mxu0 %v49_v3  ;;  %114 = vmatpush.msra.mxu1 %v49_v3 }
  0x14   :  { %109 = vmatmul.msk.f32.vlgmr.msra.gmra.mxu0 %vm57_vm0, %v47_v4  ;;  %110 = vmatmul.msk.f32.vlgmr.msra.gmra.mxu1 %vm57_vm0, %v48_v5 }
  0x91   :  { %v81_v7 = vpop.f32.mrf.mxu0  ;;  %v84_v8 = vpop.f32.mrf.mxu1 }
  0x92   :  { %v82_v9 = vadd.f32 %v120_v6, %v81_v7  ;;  %v85_v10 = vadd.f32 %v120_v6, %v84_v8 }
  0x94   :  { %87 = vst [vmem:[#allocation7] sm:$0xff] %v82_v9 }
  0x95   :  { %88 = vst [vmem:[#allocation7 + $0x8] sm:$0xff] %v85_v10 }
  0x96   :  { %101 = dma.vmem_to_hbm [thread:$0]  %s94_s25, 256, %s96_s28, [#allocation4], %s200_s20, %s200_s20, %s201_s21  }
  0x97   :  { %197 = dma.done.wait [#allocation4], 256  }
  0x98   :  { %198 = vsyncadd [#allocation4], 4294967040 }
  0x99   :  { %106 = vsyncpa [#allocation3], 1 }
  0x9a   :  { %107 = vsyncpa [#allocation6], 1 }
  0x9b   :  { %108 = vsyncpa [#allocation4], 1 }

</bundles_post_ra>
